<compile_context>
chip_gen: v5e
topology: v5e:2x2
jax: 0.10.0
libtpu: 0.0.40
codegen_flags: <defaults>
</compile_context>

<pallas_src>
import math

import jax
import jax.numpy as jnp
from jax import lax
from jax.experimental import pallas as pl
from jax.experimental.pallas import tpu as pltpu

LN_EPS = 1e-12                       # BertGenerationConfig.layer_norm_eps default
_INV_SQRT2 = 0.7071067811865475


# --------------------------------------------------------------------------
# helpers
# --------------------------------------------------------------------------

def _pick_m_tile(m):
    for t in (512, 1024, 256, 128):
        if m % t == 0:
            return t
    return m


def _pick_i_tile(i):
    for t in (512, 256, 128):
        if i % t == 0 and i > t:
            return t
    return i


def _vmem_limit_bytes(blocks):
    total = sum(math.prod(s) * jnp.dtype(d).itemsize for s, d in blocks)
    # double-buffered pipeline + headroom, clamped to sane per-chip bounds
    return int(min(max(2 * total + (2 << 20), 32 << 20), 64 << 20))


# --------------------------------------------------------------------------
# routing bookkeeping (cheap integer work feeding scalar prefetch)
# --------------------------------------------------------------------------

def _routing(task_ids, hash_indices, num_experts):
    """Exact replica of the torch dispatch-mask semantics, as index tables."""
    i32 = jnp.int32
    s_num = task_ids.shape[0]
    dest = hash_indices[task_ids].astype(i32)                          # (S,)
    hot = (dest[:, None] == jnp.arange(num_experts, dtype=i32)[None, :]).astype(i32)
    locs = (jnp.cumsum(hot, axis=0) - 1) * hot                         # (S,E)
    c_s = jnp.sum(locs, axis=1).astype(i32)                            # (S,) slot of token s
    load = jnp.sum(hot, axis=0).astype(i32)                            # (E,)
    offset = (jnp.cumsum(load) - load).astype(i32)                     # (E,) exclusive prefix

    # Compact occupied slots: expert e owns compacted slots [offset[e], offset[e]+load[e]).
    # Each token contributes exactly one occupied slot => exactly S slots total.
    tok_slot = (offset[dest] + c_s).astype(i32)                        # (S,) bijection on [0,S)
    ar = jnp.arange(s_num, dtype=i32)
    slot_e = jnp.zeros((s_num,), i32).at[tok_slot].set(dest)           # expert of slot t
    slot_c = jnp.zeros((s_num,), i32).at[tok_slot].set(c_s)            # capacity index of slot t
    slot_src = jnp.zeros((s_num,), i32).at[tok_slot].set(ar)           # token feeding slot t

    # new_mask[s, 0] of the torch code: 1 iff 0 appears in locations row s.
    if num_experts > 1:
        nm0 = jnp.ones((s_num,), i32)
    else:
        nm0 = (c_s == 0).astype(i32)

    # slot-0 content is the masked token sum:  sums[e] = sum_s hot[s,e]*nm0[s]*x[s]
    w0t = (hot.T * nm0[None, :]).astype(jnp.bfloat16)                  # (E,S)

    # gather source for each compacted slot (rows [0,S) = tokens, [S,S+E) = per-expert sums)
    slot_gsrc = jnp.where(slot_c == 0, s_num + slot_e, slot_src).astype(i32)

    return dict(
        slot_e=slot_e, slot_gsrc=slot_gsrc, w0t=w0t,
        idx_self=tok_slot,                                             # slot of token s
        idx_zero=offset[dest].astype(i32),                             # slot 0 of token's expert
        add0=nm0,                                                      # coeff of y[expert, 0]
        addc=(c_s != 0).astype(i32),                                   # coeff of y[expert, c_s]
    )


# --------------------------------------------------------------------------
# Pallas kernel 1: slot-0 segment sums   sums = w0^T @ x   (E, M), tiled over M
# --------------------------------------------------------------------------

def _segsum_kernel(w0t_ref, x_ref, o_ref):
    o_ref[...] = jnp.dot(w0t_ref[...], x_ref[...],
                         preferred_element_type=jnp.float32).astype(o_ref.dtype)


def slot0_sums(w0t_bf16, x_flat_bf16):
    e, s = w0t_bf16.shape
    _, m = x_flat_bf16.shape
    tm = _pick_m_tile(m)
    return pl.pallas_call(
        _segsum_kernel,
        out_shape=jax.ShapeDtypeStruct((e, m), jnp.bfloat16),
        grid=(m // tm,),
        in_specs=[pl.BlockSpec((e, s), lambda j: (0, 0)),
                  pl.BlockSpec((s, tm), lambda j: (0, j))],
        out_specs=pl.BlockSpec((e, tm), lambda j: (0, j)),
        compiler_params=pltpu.CompilerParams(
            dimension_semantics=("parallel",)),
    )(w0t_bf16, x_flat_bf16)


# --------------------------------------------------------------------------
# Pallas kernel 2: fused dispatch-gather + expert FFN + LayerNorm
#   grid = (occupied slots, I tiles); weights indexed only by the slot's expert
# --------------------------------------------------------------------------

def _expert_kernel(se_ref, gs_ref, x_ref, w1_ref, b1_ref, w2_ref, b2_ref,
                   g_ref, beta_ref, y_ref, acc_ref):
    i = pl.program_id(1)

    @pl.when(i == 0)
    def _init():
        acc_ref[...] = jnp.zeros_like(acc_ref)

    xin = x_ref[0]                                                  # (L, H) bf16
    h = jnp.dot(xin, w1_ref[0], preferred_element_type=jnp.float32) + b1_ref[0]
    h = 0.5 * h * (1.0 + lax.erf(h * _INV_SQRT2))                   # exact GELU
    acc_ref[...] += jnp.dot(h.astype(jnp.bfloat16), w2_ref[0],
                            preferred_element_type=jnp.float32)

    @pl.when(i == pl.num_programs(1) - 1)
    def _finalize():
        # dropout is identity in eval mode; residual + LayerNorm in f32
        z = acc_ref[...] + b2_ref[0] + xin.astype(jnp.float32)
        mu = jnp.mean(z, axis=-1, keepdims=True)
        var = jnp.mean(jnp.square(z - mu), axis=-1, keepdims=True)
        zn = (z - mu) * lax.rsqrt(var + LN_EPS)
        y_ref[0] = (zn * g_ref[0] + beta_ref[0]).astype(y_ref.dtype)


def expert_ffn(slot_e, slot_gsrc, x_aug_bf16, w1, b1, w2, b2, gamma, beta):
    ns = slot_e.shape[0]                       # number of occupied slots (== S)
    _, l, h = x_aug_bf16.shape
    e, _, i_dim = w1.shape
    ti = _pick_i_tile(i_dim)
    ki = i_dim // ti

    vmem = _vmem_limit_bytes([
        ((1, l, h), jnp.bfloat16),             # x gather block
        ((1, h, ti), jnp.bfloat16),            # w1 tile
        ((1, 1, ti), jnp.float32),             # b1 tile
        ((1, ti, h), jnp.bfloat16),            # w2 tile
        ((1, 1, h), jnp.float32),              # b2
        ((1, 1, h), jnp.float32),              # gamma
        ((1, 1, h), jnp.float32),              # beta
        ((1, l, h), jnp.bfloat16),             # output slot
        ((l, h), jnp.float32),                 # accumulator scratch
    ])

    grid_spec = pltpu.PrefetchScalarGridSpec(
        num_scalar_prefetch=2,
        grid=(ns, ki),
        in_specs=[
            # token / slot-0-sum row gather (data-dependent, resident across i)
            pl.BlockSpec((1, l, h), lambda t, i, se, gs: (gs[t], 0, 0)),
            # per-expert weights: index depends only on the expert -> stays
            # VMEM-resident across the inner I loop and same-expert slots
            pl.BlockSpec((1, h, ti), lambda t, i, se, gs: (se[t], 0, i)),
            pl.BlockSpec((1, 1, ti), lambda t, i, se, gs: (se[t], 0, i)),
            pl.BlockSpec((1, ti, h), lambda t, i, se, gs: (se[t], i, 0)),
            pl.BlockSpec((1, 1, h), lambda t, i, se, gs: (se[t], 0, 0)),
            pl.BlockSpec((1, 1, h), lambda t, i, se, gs: (se[t], 0, 0)),
            pl.BlockSpec((1, 1, h), lambda t, i, se, gs: (se[t], 0, 0)),
        ],
        out_specs=pl.BlockSpec((1, l, h), lambda t, i, se, gs: (t, 0, 0)),
        scratch_shapes=[pltpu.VMEM((l, h), jnp.float32)],
    )
    return pl.pallas_call(
        _expert_kernel,
        out_shape=jax.ShapeDtypeStruct((ns, l, h), jnp.bfloat16),
        grid_spec=grid_spec,
        compiler_params=pltpu.CompilerParams(
            dimension_semantics=("parallel", "arbitrary"),
            vmem_limit_bytes=vmem),
    )(slot_e, slot_gsrc, x_aug_bf16, w1, b1, w2, b2, gamma, beta)


# --------------------------------------------------------------------------
# Pallas kernel 3: combine (pure gather + weighted add, no dense mask matmul)
#   out[s] = addc[s] * y[slot_of(token s)] + add0[s] * y[slot0_of(expert of s)]
# --------------------------------------------------------------------------

def _combine_kernel(isf_ref, izr_ref, a0_ref, ac_ref,
                    y_self_ref, y_zero_ref, o_ref):
    s = pl.program_id(0)
    a0 = a0_ref[s].astype(jnp.float32)
    ac = ac_ref[s].astype(jnp.float32)
    o_ref[0] = (ac * y_self_ref[0].astype(jnp.float32)
                + a0 * y_zero_ref[0].astype(jnp.float32))


def moe_combine(idx_self, idx_zero, add0, addc, y_slots, out_dtype=jnp.float32):
    s, l, h = y_slots.shape
    grid_spec = pltpu.PrefetchScalarGridSpec(
        num_scalar_prefetch=4,
        grid=(s,),
        in_specs=[
            pl.BlockSpec((1, l, h), lambda t, isf, izr, a0, ac: (isf[t], 0, 0)),
            pl.BlockSpec((1, l, h), lambda t, isf, izr, a0, ac: (izr[t], 0, 0)),
        ],
        out_specs=pl.BlockSpec((1, l, h), lambda t, isf, izr, a0, ac: (t, 0, 0)),
    )
    return pl.pallas_call(
        _combine_kernel,
        out_shape=jax.ShapeDtypeStruct((s, l, h), out_dtype),
        grid_spec=grid_spec,
        compiler_params=pltpu.CompilerParams(
            dimension_semantics=("parallel",)),
    )(idx_self, idx_zero, add0, addc, y_slots, y_slots)


# --------------------------------------------------------------------------
# full forward
# --------------------------------------------------------------------------

def bert_generation_moe_forward(x, task_ids, params):
    s, l, h = x.shape
    e, _, _ = params["w1"].shape

    r = _routing(task_ids, params["hash_indices"], e)

    x_bf16 = x.astype(jnp.bfloat16)
    sums = slot0_sums(r["w0t"], x_bf16.reshape(s, l * h))            # (E, L*H) bf16
    # rows [0,S) = tokens, rows [S,S+E) = per-expert slot-0 sums
    x_aug = jnp.concatenate([x_bf16, sums.reshape(e, l, h)], axis=0)

    y_slots = expert_ffn(r["slot_e"], r["slot_gsrc"], x_aug,
                         params["w1"].astype(jnp.bfloat16), params["b1"],
                         params["w2"].astype(jnp.bfloat16), params["b2"],
                         params["gamma"], params["beta"])            # (S, L, H) bf16

    out = moe_combine(r["idx_self"], r["idx_zero"], r["add0"], r["addc"],
                      y_slots, out_dtype=x.dtype)                    # (S, L, H)
    return out, task_ids


# --------------------------------------------------------------------------
# pure-JAX references (dense-mask formulation, independent of the kernel path)
# --------------------------------------------------------------------------

def reference_forward_dense(x, task_ids, params, cast_bf16=True):
    s, l, h = x.shape
    e = params["w1"].shape[0]
    c = s
    f32 = jnp.float32

    def cvt(a):
        return a.astype(jnp.bfloat16) if cast_bf16 else a.astype(f32)

    dest = params["hash_indices"][task_ids]
    hot = (dest[:, None] == jnp.arange(e)).astype(jnp.int32)
    locs = (jnp.cumsum(hot, axis=0) - 1) * hot
    new_mask = jnp.any(locs[:, :, None] == jnp.arange(c)[None, None, :],
                       axis=1).astype(jnp.int32)
    dispatch = (hot[:, :, None] * new_mask[:, None, :]).astype(f32)   # (S,E,C)

    xs = cvt(x).astype(f32).reshape(s, -1)
    xd = jnp.einsum("sec,sm->ecm", dispatch, xs)                      # (E,C,M)
    xd = cvt(xd).reshape(e, c * l, h)
    w1 = cvt(params["w1"])
    w2 = cvt(params["w2"])

    def expert(xe, i):
        hh = jnp.dot(xe, w1[i], preferred_element_type=f32) + params["b1"][i]
        hh = 0.5 * hh * (1.0 + lax.erf(hh * _INV_SQRT2))
        yy = jnp.dot(cvt(hh), w2[i], preferred_element_type=f32) + params["b2"][i]
        z = yy + xe.astype(f32)
        mu = z.mean(-1, keepdims=True)
        var = jnp.square(z - mu).mean(-1, keepdims=True)
        return ((z - mu) * lax.rsqrt(var + LN_EPS)) * params["gamma"][i] \
            + params["beta"][i]

    y = jnp.stack([expert(xd[i], i) for i in range(e)], 0)            # (E,C*L,H)
    y = cvt(y).astype(f32).reshape(e, c, l * h)
    out = jnp.einsum("sec,ecm->sm", dispatch, y.reshape(e, c, l * h))
    return out.reshape(s, l, h)


# --------------------------------------------------------------------------
# params / demo
# --------------------------------------------------------------------------

def init_params(key, num_tasks, hidden, intermediate, seed=0):
    ks = jax.random.split(key, 4)
    w1 = jax.random.normal(ks[0], (num_tasks, hidden, intermediate),
                           jnp.float32) * 0.02
    b1 = jax.random.normal(ks[1], (num_tasks, 1, intermediate),
                           jnp.float32) * 0.02
    w2 = jax.random.normal(ks[2], (num_tasks, intermediate, hidden),
                           jnp.float32) * 0.02
    b2 = jax.random.normal(ks[3], (num_tasks, 1, hidden),
                           jnp.float32) * 0.02
    gamma = jnp.ones((num_tasks, 1, hidden), jnp.float32)
    beta = jnp.zeros((num_tasks, 1, hidden), jnp.float32)
    # HashProtocol(num_tasks, seed): deterministic task -> expert mapping
    hash_indices = jax.random.permutation(jax.random.PRNGKey(seed), num_tasks)
    return dict(w1=w1, b1=b1, w2=w2, b2=b2, gamma=gamma, beta=beta,
                hash_indices=hash_indices.astype(jnp.int32))


if __name__ == "__main__":
    # batch, seq, hidden, intermediate, num_tasks (lane-dense: H, I % 128 == 0)
    S, L, H, I, E = 8, 8, 128, 256, 4
    key = jax.random.PRNGKey(0)
    kx, kt, kp = jax.random.split(key, 3)
    x = jax.random.normal(kx, (S, L, H), jnp.float32)
    task_ids = jax.random.randint(kt, (S,), 0, E, dtype=jnp.int32)
    params = init_params(kp, E, H, I)

    fwd = jax.jit(bert_generation_moe_forward)
    out, tids = fwd(x, task_ids, params)
    out = jax.block_until_ready(out)

    assert out.shape == (S, L, H) and tids.shape == (S,)

    # tight check: reference with the same bf16-input / f32-accumulate policy
    ref_bf16 = reference_forward_dense(x, task_ids, params, cast_bf16=True)
    err_b = float(jnp.max(jnp.abs(out - ref_bf16)))
    assert jnp.allclose(out, ref_bf16, atol=1e-2, rtol=1e-2), err_b

    # loose semantic check against the full-f32 reference (bf16 rounding only)
    ref_f32 = reference_forward_dense(x, task_ids, params, cast_bf16=False)
    err_f = float(jnp.max(jnp.abs(out - ref_f32)))
    assert jnp.allclose(out, ref_f32, atol=1e-1, rtol=1e-1), err_f

    print("KERNEL_OK")
</pallas_src>

<mosaic_0001>
module attributes {stable_mosaic.version = 11 : i64} {
  func.func @_segsum_kernel(%arg0: i32, %arg1: memref<4x8xbf16, #tpu.memory_space<vmem>>, %arg2: memref<8x512xbf16, #tpu.memory_space<vmem>>, %arg3: memref<4x512xbf16, #tpu.memory_space<vmem>>) attributes {dimension_semantics = [#tpu.dimension_semantics<parallel>], iteration_bounds = array<i64: 2>, scalar_prefetch = 0 : i64, scratch_operands = 0 : i64, tpu.core_type = #tpu.core_type<tc>, window_params = [{pipeline_mode = #tpu.pipeline_mode<synchronous>, transform_indices = @transform_0, window_bounds = array<i64: 4, 8>}, {transform_indices = @transform_1, window_bounds = array<i64: 8, 512>}, {transform_indices = @transform_2, window_bounds = array<i64: 4, 512>}]} {
    %c0 = arith.constant 0 : index
    %c0_0 = arith.constant 0 : index
    %0 = vector.load %arg1[%c0, %c0_0] : memref<4x8xbf16, #tpu.memory_space<vmem>>, vector<4x8xbf16>
    %c0_1 = arith.constant 0 : index
    %c0_2 = arith.constant 0 : index
    %1 = vector.load %arg2[%c0_1, %c0_2] : memref<8x512xbf16, #tpu.memory_space<vmem>>, vector<8x512xbf16>
    %cst = arith.constant dense<0.000000e+00> : vector<4x512xf32>
    %2 = tpu.matmul %0, %1, %cst {dimension_numbers = #tpu.dot_dimension_numbers<[1], [0], [0], [1], [0, 0, 1, 1], [], []>} : vector<4x8xbf16>, vector<8x512xbf16>, vector<4x512xf32> -> vector<4x512xf32>
    %3 = arith.truncf %2 : vector<4x512xf32> to vector<4x512xbf16>
    %c0_3 = arith.constant 0 : index
    %c0_4 = arith.constant 0 : index
    %4 = vector.load %arg3[%c0_3, %c0_4] : memref<4x512xbf16, #tpu.memory_space<vmem>>, vector<4x512xbf16>
    tpu.vector_store %arg3[%c0_3, %c0_4], %3 {strides = array<i32>} : memref<4x512xbf16, #tpu.memory_space<vmem>>, vector<4x512xbf16>,
    return
  }
  func.func @transform_0(%arg0: i32) -> (i32, i32) {
    %c0_i32 = arith.constant 0 : i32
    %c0_i32_0 = arith.constant 0 : i32
    %c0_i32_1 = arith.constant 0 : i32
    return %c0_i32, %c0_i32_0 : i32, i32
  }
  func.func @transform_1(%arg0: i32) -> (i32, i32) {
    %c0_i32 = arith.constant 0 : i32
    %c0_i32_0 = arith.constant 0 : i32
    return %c0_i32, %arg0 : i32, i32
  }
  func.func @transform_2(%arg0: i32) -> (i32, i32) {
    %c0_i32 = arith.constant 0 : i32
    %c0_i32_0 = arith.constant 0 : i32
    return %c0_i32, %arg0 : i32, i32
  }
}

module attributes {stable_mosaic.version = 11 : i64} {
  func.func @_combine_kernel(%arg0: i32, %arg1: memref<8xi32, #tpu.memory_space<smem>>, %arg2: memref<8xi32, #tpu.memory_space<smem>>, %arg3: memref<8xi32, #tpu.memory_space<smem>>, %arg4: memref<8xi32, #tpu.memory_space<smem>>, %arg5: memref<1x8x128xbf16, #tpu.memory_space<vmem>>, %arg6: memref<1x8x128xbf16, #tpu.memory_space<vmem>>, %arg7: memref<1x8x128xf32, #tpu.memory_space<vmem>>) attributes {dimension_semantics = [#tpu.dimension_semantics<parallel>], iteration_bounds = array<i64: 8>, scalar_prefetch = 4 : i64, scratch_operands = 0 : i64, tpu.core_type = #tpu.core_type<tc>, window_params = [{transform_indices = @transform_0, window_bounds = array<i64: 1, 8, 128>}, {transform_indices = @transform_1, window_bounds = array<i64: 1, 8, 128>}, {transform_indices = @transform_2, window_bounds = array<i64: 1, 8, 128>}]} {
    %0 = arith.index_cast %arg0 : i32 to index
    %1 = memref.load %arg3[%0] : memref<8xi32, #tpu.memory_space<smem>>
    %2 = arith.sitofp %1 : i32 to f32
    %3 = arith.index_cast %arg0 : i32 to index
    %4 = memref.load %arg4[%3] : memref<8xi32, #tpu.memory_space<smem>>
    %5 = arith.sitofp %4 : i32 to f32
    %c0 = arith.constant 0 : index
    %c0_0 = arith.constant 0 : index
    %c0_1 = arith.constant 0 : index
    %6 = vector.load %arg5[%c0, %c0_0, %c0_1] : memref<1x8x128xbf16, #tpu.memory_space<vmem>>, vector<1x8x128xbf16>
    %7 = vector.shape_cast %6 : vector<1x8x128xbf16> to vector<8x128xbf16>
    %8 = arith.extf %7 : vector<8x128xbf16> to vector<8x128xf32>
    %9 = vector.broadcast %5 : f32 to vector<8x128xf32>
    %10 = arith.mulf %9, %8 : vector<8x128xf32>
    %c0_2 = arith.constant 0 : index
    %c0_3 = arith.constant 0 : index
    %c0_4 = arith.constant 0 : index
    %11 = vector.load %arg6[%c0_2, %c0_3, %c0_4] : memref<1x8x128xbf16, #tpu.memory_space<vmem>>, vector<1x8x128xbf16>
    %12 = vector.shape_cast %11 : vector<1x8x128xbf16> to vector<8x128xbf16>
    %13 = arith.extf %12 : vector<8x128xbf16> to vector<8x128xf32>
    %14 = vector.broadcast %2 : f32 to vector<8x128xf32>
    %15 = arith.mulf %14, %13 : vector<8x128xf32>
    %16 = arith.addf %10, %15 : vector<8x128xf32>
    %c0_5 = arith.constant 0 : index
    %c0_6 = arith.constant 0 : index
    %c0_7 = arith.constant 0 : index
    %17 = vector.load %arg7[%c0_5, %c0_6, %c0_7] : memref<1x8x128xf32, #tpu.memory_space<vmem>>, vector<1x8x128xf32>
    %18 = vector.shape_cast %17 : vector<1x8x128xf32> to vector<8x128xf32>
    %19 = vector.shape_cast %16 : vector<8x128xf32> to vector<1x8x128xf32>
    tpu.vector_store %arg7[%c0_5, %c0_6, %c0_7], %19 {strides = array<i32>} : memref<1x8x128xf32, #tpu.memory_space<vmem>>, vector<1x8x128xf32>,
    return
  }
  func.func @transform_0(%arg0: i32, %arg1: memref<8xi32, #tpu.memory_space<smem>>, %arg2: memref<8xi32, #tpu.memory_space<smem>>, %arg3: memref<8xi32, #tpu.memory_space<smem>>, %arg4: memref<8xi32, #tpu.memory_space<smem>>) -> (i32, i32, i32) {
    %0 = arith.index_cast %arg0 : i32 to index
    %1 = memref.load %arg1[%0] : memref<8xi32, #tpu.memory_space<smem>>
    %c0_i32 = arith.constant 0 : i32
    %c0_i32_0 = arith.constant 0 : i32
    %c0_i32_1 = arith.constant 0 : i32
    return %1, %c0_i32, %c0_i32_0 : i32, i32, i32
  }
  func.func @transform_1(%arg0: i32, %arg1: memref<8xi32, #tpu.memory_space<smem>>, %arg2: memref<8xi32, #tpu.memory_space<smem>>, %arg3: memref<8xi32, #tpu.memory_space<smem>>, %arg4: memref<8xi32, #tpu.memory_space<smem>>) -> (i32, i32, i32) {
    %0 = arith.index_cast %arg0 : i32 to index
    %1 = memref.load %arg2[%0] : memref<8xi32, #tpu.memory_space<smem>>
    %c0_i32 = arith.constant 0 : i32
    %c0_i32_0 = arith.constant 0 : i32
    %c0_i32_1 = arith.constant 0 : i32
    return %1, %c0_i32, %c0_i32_0 : i32, i32, i32
  }
  func.func @transform_2(%arg0: i32, %arg1: memref<8xi32, #tpu.memory_space<smem>>, %arg2: memref<8xi32, #tpu.memory_space<smem>>, %arg3: memref<8xi32, #tpu.memory_space<smem>>, %arg4: memref<8xi32, #tpu.memory_space<smem>>) -> (i32, i32, i32) {
    %c0_i32 = arith.constant 0 : i32
    %c0_i32_0 = arith.constant 0 : i32
    %c0_i32_1 = arith.constant 0 : i32
    return %arg0, %c0_i32, %c0_i32_0 : i32, i32, i32
  }
}

module attributes {stable_mosaic.version = 11 : i64} {
  func.func @_expert_kernel(%arg0: i32, %arg1: i32, %arg2: memref<8xi32, #tpu.memory_space<smem>>, %arg3: memref<8xi32, #tpu.memory_space<smem>>, %arg4: memref<1x8x128xbf16, #tpu.memory_space<vmem>>, %arg5: memref<1x128x128xbf16, #tpu.memory_space<vmem>>, %arg6: memref<1x1x128xf32, #tpu.memory_space<vmem>>, %arg7: memref<1x128x128xbf16, #tpu.memory_space<vmem>>, %arg8: memref<1x1x128xf32, #tpu.memory_space<vmem>>, %arg9: memref<1x1x128xf32, #tpu.memory_space<vmem>>, %arg10: memref<1x1x128xf32, #tpu.memory_space<vmem>>, %arg11: memref<1x8x128xbf16, #tpu.memory_space<vmem>>, %arg12: memref<8x128xf32, #tpu.memory_space<vmem>>) attributes {dimension_semantics = [#tpu.dimension_semantics<parallel>, #tpu.dimension_semantics<arbitrary>], iteration_bounds = array<i64: 8, 2>, scalar_prefetch = 2 : i64, scratch_operands = 1 : i64, tpu.core_type = #tpu.core_type<tc>, window_params = [{transform_indices = @transform_0, window_bounds = array<i64: 1, 8, 128>}, {transform_indices = @transform_1, window_bounds = array<i64: 1, 128, 128>}, {transform_indices = @transform_2, window_bounds = array<i64: 1, 1, 128>}, {transform_indices = @transform_3, window_bounds = array<i64: 1, 128, 128>}, {transform_indices = @transform_4, window_bounds = array<i64: 1, 1, 128>}, {transform_indices = @transform_5, window_bounds = array<i64: 1, 1, 128>}, {transform_indices = @transform_6, window_bounds = array<i64: 1, 1, 128>}, {transform_indices = @transform_7, window_bounds = array<i64: 1, 8, 128>}]} {
    %c0_i32 = arith.constant 0 : i32
    %0 = arith.cmpi eq, %arg1, %c0_i32 : i32
    %1 = arith.extui %0 : i1 to i32
    %c0_i32_0 = arith.constant 0 : i32
    %2 = arith.cmpi ne, %1, %c0_i32_0 : i32
    scf.if %2 {
      %cst_21 = arith.constant 0.000000e+00 : f32
      %30 = vector.broadcast %cst_21 : f32 to vector<8x128xf32>
      %c0_22 = arith.constant 0 : index
      %c0_23 = arith.constant 0 : index
      %31 = vector.load %arg12[%c0_22, %c0_23] : memref<8x128xf32, #tpu.memory_space<vmem>>, vector<8x128xf32>
      tpu.vector_store %arg12[%c0_22, %c0_23], %30 {strides = array<i32>} : memref<8x128xf32, #tpu.memory_space<vmem>>, vector<8x128xf32>,
    } else {
    }
    %c0 = arith.constant 0 : index
    %c0_1 = arith.constant 0 : index
    %c0_2 = arith.constant 0 : index
    %3 = vector.load %arg4[%c0, %c0_1, %c0_2] : memref<1x8x128xbf16, #tpu.memory_space<vmem>>, vector<1x8x128xbf16>
    %4 = vector.shape_cast %3 : vector<1x8x128xbf16> to vector<8x128xbf16>
    %c0_3 = arith.constant 0 : index
    %c0_4 = arith.constant 0 : index
    %c0_5 = arith.constant 0 : index
    %5 = vector.load %arg5[%c0_3, %c0_4, %c0_5] : memref<1x128x128xbf16, #tpu.memory_space<vmem>>, vector<1x128x128xbf16>
    %6 = vector.shape_cast %5 : vector<1x128x128xbf16> to vector<128x128xbf16>
    %cst = arith.constant dense<0.000000e+00> : vector<8x128xf32>
    %7 = tpu.matmul %4, %6, %cst {dimension_numbers = #tpu.dot_dimension_numbers<[1], [0], [0], [1], [0, 0, 1, 1], [], []>} : vector<8x128xbf16>, vector<128x128xbf16>, vector<8x128xf32> -> vector<8x128xf32>
    %c0_6 = arith.constant 0 : index
    %c0_7 = arith.constant 0 : index
    %c0_8 = arith.constant 0 : index
    %8 = vector.load %arg6[%c0_6, %c0_7, %c0_8] : memref<1x1x128xf32, #tpu.memory_space<vmem>>, vector<1x1x128xf32>
    %9 = vector.shape_cast %8 : vector<1x1x128xf32> to vector<1x128xf32>
    %10 = vector.broadcast %9 : vector<1x128xf32> to vector<8x128xf32>
    %11 = arith.addf %7, %10 : vector<8x128xf32>
    %cst_9 = arith.constant 5.000000e-01 : f32
    %12 = vector.broadcast %cst_9 : f32 to vector<8x128xf32>
    %13 = arith.mulf %12, %11 : vector<8x128xf32>
    %cst_10 = arith.constant 0.707106769 : f32
    %14 = vector.broadcast %cst_10 : f32 to vector<8x128xf32>
    %15 = arith.mulf %11, %14 : vector<8x128xf32>
    %16 = math.erf %15 : vector<8x128xf32>
    %cst_11 = arith.constant 1.000000e+00 : f32
    %17 = vector.broadcast %cst_11 : f32 to vector<8x128xf32>
    %18 = arith.addf %17, %16 : vector<8x128xf32>
    %19 = arith.mulf %13, %18 : vector<8x128xf32>
    %c0_12 = arith.constant 0 : index
    %c0_13 = arith.constant 0 : index
    %20 = vector.load %arg12[%c0_12, %c0_13] : memref<8x128xf32, #tpu.memory_space<vmem>>, vector<8x128xf32>
    %21 = arith.truncf %19 : vector<8x128xf32> to vector<8x128xbf16>
    %c0_14 = arith.constant 0 : index
    %c0_15 = arith.constant 0 : index
    %c0_16 = arith.constant 0 : index
    %22 = vector.load %arg7[%c0_14, %c0_15, %c0_16] : memref<1x128x128xbf16, #tpu.memory_space<vmem>>, vector<1x128x128xbf16>
    %23 = vector.shape_cast %22 : vector<1x128x128xbf16> to vector<128x128xbf16>
    %cst_17 = arith.constant dense<0.000000e+00> : vector<8x128xf32>
    %24 = tpu.matmul %21, %23, %cst_17 {dimension_numbers = #tpu.dot_dimension_numbers<[1], [0], [0], [1], [0, 0, 1, 1], [], []>} : vector<8x128xbf16>, vector<128x128xbf16>, vector<8x128xf32> -> vector<8x128xf32>
    %25 = arith.addf %20, %24 : vector<8x128xf32>
    %c0_18 = arith.constant 0 : index
    %c0_19 = arith.constant 0 : index
    %26 = vector.load %arg12[%c0_18, %c0_19] : memref<8x128xf32, #tpu.memory_space<vmem>>, vector<8x128xf32>
    tpu.vector_store %arg12[%c0_18, %c0_19], %25 {strides = array<i32>} : memref<8x128xf32, #tpu.memory_space<vmem>>, vector<8x128xf32>,
    %c1_i32 = arith.constant 1 : i32
    %27 = arith.cmpi eq, %arg1, %c1_i32 : i32
    %28 = arith.extui %27 : i1 to i32
    %c0_i32_20 = arith.constant 0 : i32
    %29 = arith.cmpi ne, %28, %c0_i32_20 : i32
    scf.if %29 {
      %c0_21 = arith.constant 0 : index
      %c0_22 = arith.constant 0 : index
      %30 = vector.load %arg12[%c0_21, %c0_22] : memref<8x128xf32, #tpu.memory_space<vmem>>, vector<8x128xf32>
      %c0_23 = arith.constant 0 : index
      %c0_24 = arith.constant 0 : index
      %c0_25 = arith.constant 0 : index
      %31 = vector.load %arg8[%c0_23, %c0_24, %c0_25] : memref<1x1x128xf32, #tpu.memory_space<vmem>>, vector<1x1x128xf32>
      %32 = vector.shape_cast %31 : vector<1x1x128xf32> to vector<1x128xf32>
      %33 = vector.broadcast %32 : vector<1x128xf32> to vector<8x128xf32>
      %34 = arith.addf %30, %33 : vector<8x128xf32>
      %35 = arith.extf %4 : vector<8x128xbf16> to vector<8x128xf32>
      %36 = arith.addf %34, %35 : vector<8x128xf32>
      %cst_26 = arith.constant dense<0.000000e+00> : vector<8xf32>
      %37 = vector.multi_reduction <add>, %36, %cst_26 [1] : vector<8x128xf32> to vector<8xf32>
      %38 = vector.shape_cast %37 : vector<8xf32> to vector<8x1xf32>
      %cst_27 = arith.constant 1.280000e+02 : f32
      %39 = vector.broadcast %cst_27 : f32 to vector<8x1xf32>
      %40 = arith.divf %38, %39 : vector<8x1xf32>
      %41 = vector.broadcast %40 : vector<8x1xf32> to vector<8x128xf32>
      %42 = arith.subf %36, %41 : vector<8x128xf32>
      %43 = arith.mulf %42, %42 : vector<8x128xf32>
      %cst_28 = arith.constant dense<0.000000e+00> : vector<8xf32>
      %44 = vector.multi_reduction <add>, %43, %cst_28 [1] : vector<8x128xf32> to vector<8xf32>
      %45 = vector.shape_cast %44 : vector<8xf32> to vector<8x1xf32>
      %cst_29 = arith.constant 1.280000e+02 : f32
      %46 = vector.broadcast %cst_29 : f32 to vector<8x1xf32>
      %47 = arith.divf %45, %46 : vector<8x1xf32>
      %48 = vector.broadcast %40 : vector<8x1xf32> to vector<8x128xf32>
      %49 = arith.subf %36, %48 : vector<8x128xf32>
      %cst_30 = arith.constant 9.99999996E-13 : f32
      %50 = vector.broadcast %cst_30 : f32 to vector<8x1xf32>
      %51 = arith.addf %47, %50 : vector<8x1xf32>
      %52 = math.rsqrt %51 : vector<8x1xf32>
      %53 = vector.broadcast %52 : vector<8x1xf32> to vector<8x128xf32>
      %54 = arith.mulf %49, %53 : vector<8x128xf32>
      %c0_31 = arith.constant 0 : index
      %c0_32 = arith.constant 0 : index
      %c0_33 = arith.constant 0 : index
      %55 = vector.load %arg9[%c0_31, %c0_32, %c0_33] : memref<1x1x128xf32, #tpu.memory_space<vmem>>, vector<1x1x128xf32>
      %56 = vector.shape_cast %55 : vector<1x1x128xf32> to vector<1x128xf32>
      %57 = vector.broadcast %56 : vector<1x128xf32> to vector<8x128xf32>
      %58 = arith.mulf %54, %57 : vector<8x128xf32>
      %c0_34 = arith.constant 0 : index
      %c0_35 = arith.constant 0 : index
      %c0_36 = arith.constant 0 : index
      %59 = vector.load %arg10[%c0_34, %c0_35, %c0_36] : memref<1x1x128xf32, #tpu.memory_space<vmem>>, vector<1x1x128xf32>
      %60 = vector.shape_cast %59 : vector<1x1x128xf32> to vector<1x128xf32>
      %61 = vector.broadcast %60 : vector<1x128xf32> to vector<8x128xf32>
      %62 = arith.addf %58, %61 : vector<8x128xf32>
      %63 = arith.truncf %62 : vector<8x128xf32> to vector<8x128xbf16>
      %c0_37 = arith.constant 0 : index
      %c0_38 = arith.constant 0 : index
      %c0_39 = arith.constant 0 : index
      %64 = vector.load %arg11[%c0_37, %c0_38, %c0_39] : memref<1x8x128xbf16, #tpu.memory_space<vmem>>, vector<1x8x128xbf16>
      %65 = vector.shape_cast %64 : vector<1x8x128xbf16> to vector<8x128xbf16>
      %66 = vector.shape_cast %63 : vector<8x128xbf16> to vector<1x8x128xbf16>
      tpu.vector_store %arg11[%c0_37, %c0_38, %c0_39], %66 {strides = array<i32>} : memref<1x8x128xbf16, #tpu.memory_space<vmem>>, vector<1x8x128xbf16>,
    } else {
    }
    return
  }
  func.func @transform_0(%arg0: i32, %arg1: i32, %arg2: memref<8xi32, #tpu.memory_space<smem>>, %arg3: memref<8xi32, #tpu.memory_space<smem>>) -> (i32, i32, i32) {
    %0 = arith.index_cast %arg0 : i32 to index
    %1 = memref.load %arg3[%0] : memref<8xi32, #tpu.memory_space<smem>>
    %c0_i32 = arith.constant 0 : i32
    %c0_i32_0 = arith.constant 0 : i32
    %c0_i32_1 = arith.constant 0 : i32
    return %1, %c0_i32, %c0_i32_0 : i32, i32, i32
  }
  func.func @transform_1(%arg0: i32, %arg1: i32, %arg2: memref<8xi32, #tpu.memory_space<smem>>, %arg3: memref<8xi32, #tpu.memory_space<smem>>) -> (i32, i32, i32) {
    %0 = arith.index_cast %arg0 : i32 to index
    %1 = memref.load %arg2[%0] : memref<8xi32, #tpu.memory_space<smem>>
    %c0_i32 = arith.constant 0 : i32
    %c0_i32_0 = arith.constant 0 : i32
    return %1, %c0_i32, %arg1 : i32, i32, i32
  }
  func.func @transform_2(%arg0: i32, %arg1: i32, %arg2: memref<8xi32, #tpu.memory_space<smem>>, %arg3: memref<8xi32, #tpu.memory_space<smem>>) -> (i32, i32, i32) {
    %0 = arith.index_cast %arg0 : i32 to index
    %1 = memref.load %arg2[%0] : memref<8xi32, #tpu.memory_space<smem>>
    %c0_i32 = arith.constant 0 : i32
    %c0_i32_0 = arith.constant 0 : i32
    return %1, %c0_i32, %arg1 : i32, i32, i32
  }
  func.func @transform_3(%arg0: i32, %arg1: i32, %arg2: memref<8xi32, #tpu.memory_space<smem>>, %arg3: memref<8xi32, #tpu.memory_space<smem>>) -> (i32, i32, i32) {
    %0 = arith.index_cast %arg0 : i32 to index
    %1 = memref.load %arg2[%0] : memref<8xi32, #tpu.memory_space<smem>>
    %c0_i32 = arith.constant 0 : i32
    %c0_i32_0 = arith.constant 0 : i32
    return %1, %arg1, %c0_i32 : i32, i32, i32
  }
  func.func @transform_4(%arg0: i32, %arg1: i32, %arg2: memref<8xi32, #tpu.memory_space<smem>>, %arg3: memref<8xi32, #tpu.memory_space<smem>>) -> (i32, i32, i32) {
    %0 = arith.index_cast %arg0 : i32 to index
    %1 = memref.load %arg2[%0] : memref<8xi32, #tpu.memory_space<smem>>
    %c0_i32 = arith.constant 0 : i32
    %c0_i32_0 = arith.constant 0 : i32
    %c0_i32_1 = arith.constant 0 : i32
    return %1, %c0_i32, %c0_i32_0 : i32, i32, i32
  }
  func.func @transform_5(%arg0: i32, %arg1: i32, %arg2: memref<8xi32, #tpu.memory_space<smem>>, %arg3: memref<8xi32, #tpu.memory_space<smem>>) -> (i32, i32, i32) {
    %0 = arith.index_cast %arg0 : i32 to index
    %1 = memref.load %arg2[%0] : memref<8xi32, #tpu.memory_space<smem>>
    %c0_i32 = arith.constant 0 : i32
    %c0_i32_0 = arith.constant 0 : i32
    %c0_i32_1 = arith.constant 0 : i32
    return %1, %c0_i32, %c0_i32_0 : i32, i32, i32
  }
  func.func @transform_6(%arg0: i32, %arg1: i32, %arg2: memref<8xi32, #tpu.memory_space<smem>>, %arg3: memref<8xi32, #tpu.memory_space<smem>>) -> (i32, i32, i32) {
    %0 = arith.index_cast %arg0 : i32 to index
    %1 = memref.load %arg2[%0] : memref<8xi32, #tpu.memory_space<smem>>
    %c0_i32 = arith.constant 0 : i32
    %c0_i32_0 = arith.constant 0 : i32
    %c0_i32_1 = arith.constant 0 : i32
    return %1, %c0_i32, %c0_i32_0 : i32, i32, i32
  }
  func.func @transform_7(%arg0: i32, %arg1: i32, %arg2: memref<8xi32, #tpu.memory_space<smem>>, %arg3: memref<8xi32, #tpu.memory_space<smem>>) -> (i32, i32, i32) {
    %c0_i32 = arith.constant 0 : i32
    %c0_i32_0 = arith.constant 0 : i32
    %c0_i32_1 = arith.constant 0 : i32
    return %arg0, %c0_i32, %c0_i32_0 : i32, i32, i32
  }
}

</mosaic_0001>

<bundles_post_ra>
// kernel: bert_generation_moe_forward.3
= control target key start
LH: loop header
LB: loop body
LE: loop exit
PB: predicated region body
PF: predicated region fallthrough
CT: control target
= control target key end

     0   :  { %s350_s9 = smov 0   ;;  %s379_s0 = inlined_call_operand.vmem [shape: bf16[4,8], index: 0, kind: input, shape index: {}]   ;;  %s380_s1 = inlined_call_operand.vmem [shape: bf16[8,1024], index: 1, kind: input, shape index: {}]   ;;  %s381_s2 = inlined_call_operand.vmem [shape: bf16[4,1024], index: 2, kind: output, shape index: {}]  }
   0x1 LB: > { %s304_s10 = sadd.s32 4294967295, %s333_s9   ;;  %p308_p0 = scmp.ge.s32.totalorder %s333_s9, 1  ;;  %s333_s9 = sphi %s350_s9, %s12_s9  }
   0x2   : > { %p113_p1 = scmp.lt.s32.totalorder %s333_s9, 3 }
   0x4   : > { %p114_p2 = pnand %p308_p0, %p113_p1 }
   0x5   : > { %s309_s11 = sshll.u32 (!%p114_p2), %s304_s10, 2 }
   0x6   : > { %117 = sbr.rel (%p114_p2) target bundleno = 164 (0xa4), region = 28  ;;  %p136_p3 = scmp.lt.s32.totalorder (!%p114_p2), %s309_s11, 7 }
   0xb   : > { %s383_s11 = smov (!%p136_p3, %s309_s11), 7  ;;  %vm165_vm0 = vcmask 1043456   ;;  %v148_v14 = vld [vmem:[%s379_s0] sm:$0x3]  ;;  %vm161_vm1 = vcmask 64512   ;;  %vm237_vm2 = vcmask 1041408  }
   0xc   : > { %s310_s12 = sshll.u32 %s383_s11, 2  ;;  %s312_s18 = sshll.u32 %s383_s11, 1  ;;  %vm241_vm3 = vcmask 1045508  }
   0xd   : > { %s139_s15 = scalar_lea.vmem %s380_s1, %s310_s12  ;;  %s145_s21 = scalar_lea.vmem %s381_s2, %s312_s18 }
   0xe   : > { %v149_v0 = vld [vmem:[%s139_s15] sm:$0xff]  ;;  %v150_v1 = vld [vmem:[%s139_s15 + $0x8] sm:$0xff] }
   0xf   : > { %v153_v2 = vunpack.c.l.b16 %v149_v0  ;;  %v154_v3 = vunpack.c.h.b16 %v149_v0  ;;  %v155_v4 = vunpack.c.l.b16 %v150_v1  ;;  %v156_v5 = vunpack.c.h.b16 %v150_v1 }
  0x11   : > { %v157_v6 = vpack.c.b16 %v153_v2, %v153_v2  ;;  %v158_v7 = vpack.c.b16 %v154_v3, %v154_v3  ;;  %v159_v8 = vpack.c.b16 %v155_v4, %v155_v4  ;;  %v160_v9 = vpack.c.b16 %v156_v5, %v156_v5 }
  0x13   : > { %v167_v10 = vsel %vm165_vm0, %v157_v6, 0  ;;  %v170_v11 = vsel %vm165_vm0, %v158_v7, 0  ;;  %v173_v12 = vsel %vm165_vm0, %v159_v8, 0  ;;  %v176_v13 = vsel %vm165_vm0, %v160_v9, 0 }
  0x14   : > { %185 = vmatpush.bf16.msra.mxu0 %v167_v10  ;;  %198 = vmatpush.bf16.msra.mxu1 %v170_v11 }
  0x15   : > { %211 = vmatpush.bf16.msra.mxu2 %v173_v12  ;;  %224 = vmatpush.bf16.msra.mxu3 %v176_v13 }
  0x17   : > { %313 = vmatmul.msk.bf16.vlgmr.msra.gmra.mxu0 %vm161_vm1, %v148_v14  ;;  %314 = vmatmul.msk.bf16.vlgmr.msra.gmra.mxu1 %vm161_vm1, %v148_v14 }
  0x18   : > { %315 = vmatmul.msk.bf16.vlgmr.msra.gmra.mxu2 %vm161_vm1, %v148_v14  ;;  %316 = vmatmul.msk.bf16.vlgmr.msra.gmra.mxu3 %vm161_vm1, %v148_v14 }
  0x94   : > { %v187_v15 = vpop.f32.mrf.mxu0  ;;  %v200_v16 = vpop.f32.mrf.mxu1 }
  0x95   : > { %v230_v17 = vpack.c.bf16 %v200_v16, %v187_v15 }
  0x97   : > { %v234_v20 = vrot.slane %v230_v17, 2 }
  0x99   : > { %v240_v26 = vsel %vm237_vm2, %v230_v17, %v234_v20 }
  0x9b   : > { %v213_v18 = vpop.f32.mrf.mxu2  ;;  %v226_v19 = vpop.f32.mrf.mxu3 }
  0x9c   : > { %v231_v21 = vpack.c.bf16 %v226_v19, %v213_v18  ;;  %v189_v22 = vpop.f32.mrf.mxu0  ;;  %v202_v23 = vpop.f32.mrf.mxu1 }
  0x9e   : > { %v235_v24 = vrot.slane %v231_v21, 4  ;;  %v236_v25 = vrot.slane %v231_v21, 6 }
  0xa0   : > { %v244_v27 = vsel %vm241_vm3, %v235_v24, %v236_v25 }
  0xa1   : > { %v245_v28 = vsel %vm165_vm0, %v240_v26, %v244_v27 }
  0xa2   : > { %247 = vst [vmem:[%s145_s21] sm:$0xff] %v245_v28 }
  0xa3   : > { %v215_v29 = vpop.f32.mrf.mxu2  ;;  %v228_v30 = vpop.f32.mrf.mxu3 }
  0xa4 PF: > { %s12_s9 = sadd.s32 1, %s333_s9  }
  0xa5   : > { %p9_p4 = scmp.ge.s32.totalorder %s12_s9, 4  }
  0xa7   :  { %11 = sbr.rel (!%p9_p4) target bundleno = 1 (0x1), region = 58 }

// kernel: bert_generation_moe_forward.5
= control target key start
LH: loop header
LB: loop body
LE: loop exit
PB: predicated region body
PF: predicated region fallthrough
CT: control target
= control target key end

     0   :  { %s466_s27 = smov [#allocation3]   ;;  %s467_s28 = smov [#allocation4]   ;;  %s603_s0 = inlined_call_operand.vmem [shape: s32[8], index: 0, kind: input, shape index: {}]   ;;  %s604_s4 = inlined_call_operand.vmem [shape: bf16[8,8,128], index: 4, kind: input, shape index: {}, may-alias: {4,5}]   ;;  %s605_s5 = inlined_call_operand.vmem [shape: bf16[8,8,128], index: 5, kind: input, shape index: {}, may-alias: {4,5}]   ;;  %s606_s6 = inlined_call_operand.hbm [shape: f32[8,8,128], index: 6, kind: output, shape index: {}]   ;;  %s607_s1 = inlined_call_operand.vmem [shape: s32[8], index: 1, kind: input, shape index: {}]   ;;  %s608_s2 = inlined_call_operand.vmem [shape: s32[8], index: 2, kind: input, shape index: {}]   ;;  %s609_s3 = inlined_call_operand.vmem [shape: s32[8], index: 3, kind: input, shape index: {}]  }
   0x1   :  { %s12_s23 = sshll.u32 %s603_s0, 4  ;;  %s17_s26 = sshll.u32 %s607_s1, 4  ;;  %s13_s23 = int_to_ptr.vmem [resolvable:$true] %s12_s23  ;;  %s18_s26 = int_to_ptr.vmem [resolvable:$true] %s17_s26 }
   0x2   :  { %15 = dma.vmem_to_smem %s13_s23, 16, %s466_s27, [#allocation2] }
   0x3   :  { %20 = dma.vmem_to_smem %s18_s26, 16, %s467_s28, [#allocation2] }
   0x4   :  { %s22_s7 = sshll.u32 %s608_s2, 4  ;;  %s27_s10 = sshll.u32 %s609_s3, 4  ;;  %s23_s7 = int_to_ptr.vmem [resolvable:$true] %s22_s7  ;;  %s28_s10 = int_to_ptr.vmem [resolvable:$true] %s27_s10 }
   0x5   :  { %s468_s0 = smov [#allocation5]   ;;  %s469_s11 = smov [#allocation6]  }
   0x6   :  { %25 = dma.vmem_to_smem %s23_s7, 16, %s468_s0, [#allocation2] }
   0x7   :  { %30 = dma.vmem_to_smem %s28_s10, 16, %s469_s11, [#allocation2] }
   0x8   :  { %444 = dma.done.wait [#allocation2], 64 }
   0x9   :  { %445 = vsyncadd [#allocation2], 4294967232 }
   0xa   :  { %33 = sfence }
   0xb   :  { %34 = vsyncpa [#allocation8], 0 }
   0xc   :  { %36 = vsyncpa [#allocation8 + $0x1], 0  ;;  %s517_s1 = smov 0   ;;  %s519_s12 = smov 0  }
   0xd   :  { %s521_s2 = smov 0   ;;  %s523_s13 = smov 0  }
   0xe LB: > { %s297_s3 = sadd.s32 4294967295, %s464_s13   ;;  %s298_s14 = sadd.s32 4294967294, %s464_s13   ;;  %s464_s13 = sphi %s523_s13, %s615_s13   ;;  %s460_s2 = sphi %s521_s2, %s614_s2   ;;  %s456_s12 = sphi %s519_s12, %s613_s12   ;;  %s452_s1 = sphi %s517_s1, %s612_s1  }
   0xf   : > { %s540_s15 = sadd.s32 1, %s464_s13   ;;  %s105_s16 = sadd.s32 1, %s460_s2 }
  0x10   : > { %s102_s17 = ssub.s32 %s464_s13, %s540_s15  ;;  %p115_p0 = scmp.ne.s32.totalorder %s460_s2, %s456_s12 }
  0x11   : > { %p103_p1 = scmp.eq.s32.totalorder %s102_s17, 0  ;;  %p116_p2 = scmp.eq.s32.totalorder %s297_s3, 7 }
  0x12   : > { %p121_p3 = scmp.ne.s32.totalorder %s456_s12, %s452_s1  ;;  %p122_p4 = scmp.eq.s32.totalorder %s298_s14, 7 }
  0x13   : > { %s550_s18 = scalar_select %p103_p1, %s460_s2, %s105_s16  }
  0x14   : > { %p552_p5 = por %p116_p2, %p115_p0  ;;  %p556_p6 = por %p122_p4, %p121_p3 }
  0x15   : > { %p301_p7 = scmp.ge.s32.totalorder %s464_s13, 1  ;;  %p158_p8 = scmp.lt.s32.totalorder %s464_s13, 9 }
  0x17   : > { %p159_p9 = pnand %p301_p7, %p158_p8 }
  0x18   : > { %s182_s21 = sand.u32 (!%p159_p9), 1, %s456_s12   ;;  %s185_s22 = sld [smem:[#allocation3 + %s297_s3]] (!%p159_p9) }
  0x19   : > { %162 = sbr.rel (%p159_p9) target bundleno = 49 (0x31), region = 28  ;;  %s191_s23 = sld [smem:[#allocation4 + %s297_s3]] (!%p159_p9) }
  0x1a   : > { %s197_s24 = sld [smem:[#allocation5 + %s297_s3]] (!%p159_p9)  ;;  %s302_s25 = sshll.u32 (!%p159_p9), %s182_s21, 3 }
  0x1b   : > { %s199_s26 = sld [smem:[#allocation6 + %s297_s3]] (!%p159_p9)  ;;  %s306_s27 = sshll.u32 (!%p159_p9), %s297_s3, 3 }
  0x1c   : > { %s222_s30 = scalar_lea.hbm (!%p159_p9), %s606_s6, %s306_s27 }
  0x1d   : > { %s226_s27 = sshll.u32 (!%p159_p9), %s222_s30, 4  ;;  %s227_s27 = int_to_ptr.hbm [resolvable:$true] %s226_s27 }
  0x1e   : > { %p186_p10 = scmp.lt.s32.totalorder %s185_s22, 7 }
  0x1f   : > { %p192_p11 = scmp.lt.s32.totalorder %s191_s23, 7 }
  0x20   : > { %s617_s22 = smov (!%p186_p10, %s185_s22), 7  ;;  %s198_s8 = scvt.s32.f32 %s197_s24 }
  0x21   : > { %s619_s23 = smov (!%p192_p11, %s191_s23), 7  ;;  %s303_s7 = sshll.u32 %s617_s22, 2 }
  0x22   : > { %s189_s0 = scalar_lea.vmem %s604_s4, %s303_s7  ;;  %s304_s11 = sshll.u32 %s619_s23, 2  ;;  %v207_v3 = vstv %s198_s8 }
  0x23   : > { %s195_s17 = scalar_lea.vmem %s605_s5, %s304_s11  ;;  %s200_s3 = scvt.s32.f32 %s199_s26  ;;  %v201_v0 = vld [vmem:[%s189_s0] sm:$0xf] }
  0x24   : > { %v202_v1 = vunpack.c.l.bf16 %v201_v0  ;;  %v205_v2 = vld [vmem:[%s195_s17] sm:$0xf]  ;;  %s184_s22 = scalar_lea.vmem [#allocation7], %s302_s25  ;;  %s212_s23 = scalar_lea.sflag [#allocation8], %s182_s21 }
  0x25   : > { %v203_v4 = vstv %s200_s3  ;;  %v206_v5 = vunpack.c.l.bf16 %v205_v2  ;;  %s224_s24 = sshll.u32 %s184_s22, 4  ;;  %s414_s26 = sshra.s32 %s227_s27, 4  ;;  %s225_s24 = int_to_ptr.vmem [resolvable:$true] %s224_s24  ;;  %s415_s26 = int_to_ptr.hbm [resolvable:$true] %s414_s26 }
  0x26   : > { %v204_v6 = vmul.f32 %v203_v4, %v202_v1  ;;  %s416_s28 = scalar_lea.hbm %s415_s26, 8  ;;  %s420_s25 = scalar_lea.hbm %s606_s6, 64 }
  0x27   : > { %v208_v7 = vmul.f32 %v207_v3, %v206_v5  ;;  %p417_p12 = scmp.ne.s32.totalorder %s415_s26, %s416_s28  ;;  %p421_p1 = scmp.lt.s32.totalorder %s415_s26, %s606_s6 }
  0x28   : > { %p422_p2 = scmp.lt.s32.totalorder %s420_s25, %s416_s28 }
  0x29   : > { %v209_v8 = vadd.f32 %v208_v7, %v204_v6  ;;  %p418_p13 = pnand %p417_p12, %p552_p5 }
  0x2a   : > { %p423_p3 = por %p422_p2, %p421_p1 }
  0x2b   : > { %210 = vst [vmem:[%s184_s22] sm:$0xff] %v209_v8  ;;  %p419_p0 = pneg %p418_p13 }
  0x2d   : > { %p424_p4 = pnand %p423_p3, %p419_p0 }
  0x2f   : > { %427 = shalt.err (!%p424_p4)
}
  0x30   : > { %309 = dma.vmem_to_hbm [thread:$0]  (%p552_p5), %s225_s24, 128, %s227_s27, %s212_s23  }
  0x31 PF: > { %p315_p7 = scmp.ge.s32.totalorder %s464_s13, 2  ;;  %s238_s21 = sand.u32 1, %s452_s1  }
  0x32   : > { %s239_s9 = scalar_lea.sflag [#allocation8], %s238_s21 }
  0x33   : > { %p312_p8 = pnand %p315_p7, %p556_p6 }
  0x35   : > { %p313_p9 = pneg %p312_p8 }
  0x37   : > { %447 = dma.done.wait (%p313_p9), %s239_s9, 128  }
  0x38   : > { %449 = vsyncadd (%p313_p9), %s239_s9, 4294967168  ;;  %p39_p10 = scmp.ge.s32.totalorder %s540_s15, 10   ;;  %s612_s1 = smov %s456_s12 }
  0x39   : > { %s613_s12 = smov %s460_s2  ;;  %s614_s2 = smov %s550_s18 }
  0x3a   : > { %s615_s13 = smov %s540_s15  ;;  %41 = sbr.rel (!%p39_p10) target bundleno = 14 (0xe), region = 66 }
  0x3f   :  { %245 = vsyncpa [#allocation8], 1 }
  0x40   :  { %247 = vsyncpa [#allocation8 + $0x1], 1 }

// kernel: bert_generation_moe_forward.4
= control target key start
LH: loop header
LB: loop body
LE: loop exit
PB: predicated region body
PF: predicated region fallthrough
CT: control target
= control target key end

     0   :  { %s1239_s15 = smov [#allocation4]   ;;  %s1240_s16 = smov [#allocation5]   ;;  %s1496_s0 = inlined_call_operand.vmem [shape: s32[8], index: 0, kind: input, shape index: {}]   ;;  %s1497_s2 = inlined_call_operand.vmem [shape: bf16[12,8,128], index: 2, kind: input, shape index: {}]   ;;  %s1498_s3 = inlined_call_operand.vmem [shape: bf16[4,128,256], index: 3, kind: input, shape index: {}]   ;;  %s1499_s4 = inlined_call_operand.vmem [shape: f32[4,1,256], index: 4, kind: input, shape index: {}]   ;;  %s1500_s5 = inlined_call_operand.vmem [shape: bf16[4,256,128], index: 5, kind: input, shape index: {}]   ;;  %s1501_s6 = inlined_call_operand.vmem [shape: f32[4,1,128], index: 6, kind: input, shape index: {}]   ;;  %s1502_s7 = inlined_call_operand.vmem [shape: f32[4,1,128], index: 7, kind: input, shape index: {}]   ;;  %s1503_s8 = inlined_call_operand.vmem [shape: f32[4,1,128], index: 8, kind: input, shape index: {}]   ;;  %s1504_s9 = inlined_call_operand.vmem [shape: bf16[8,8,128], index: 9, kind: output, shape index: {}]   ;;  %s1505_s1 = inlined_call_operand.vmem [shape: s32[8], index: 1, kind: input, shape index: {}]  }
   0x1   :  { %1510 = sst [smem:[#allocation13_spill]] %s1498_s3  ;;  %s15_s11 = sshll.u32 %s1496_s0, 4  ;;  %s16_s11 = int_to_ptr.vmem [resolvable:$true] %s15_s11 }
   0x2   :  { %s20_s14 = sshll.u32 %s1505_s1, 4  ;;  %s21_s14 = int_to_ptr.vmem [resolvable:$true] %s20_s14 }
   0x3   :  { %18 = dma.vmem_to_smem %s16_s11, 16, %s1239_s15, [#allocation3] }
   0x4   :  { %23 = dma.vmem_to_smem %s21_s14, 16, %s1240_s16, [#allocation3] }
   0x5   :  { %1209 = dma.done.wait [#allocation3], 32 }
   0x6   :  { %1210 = vsyncadd [#allocation3], 4294967264 }
   0x7   :  { %26 = sfence }
   0x8   :  { %s1299_s17 = smov 0   ;;  %s1301_s18 = smov 0  }
   0x9   :  { %s1303_s19 = smov 0   ;;  %s1305_s0 = smov 0  }
   0xa   :  { %s1307_s20 = smov 0   ;;  %s1309_s1 = smov 0  }
   0xb   :  { %s1311_s21 = smov 0  }
   0xc LB: > { %1511 = sst [smem:[#allocation8_spill]] %s1229_s20  ;;  %s41_s22 = sadd.s32 1, %s1229_s20  ;;  %s1237_s21 = sphi %s1311_s21, %s32_s21   ;;  %s1233_s1 = sphi %s1309_s1, %s1523_s1   ;;  %s1229_s20 = sphi %s1307_s20, %s1522_s20   ;;  %s1225_s0 = sphi %s1305_s0, %s1521_s0   ;;  %s1221_s19 = sphi %s1303_s19, %s1520_s19   ;;  %s1217_s18 = sphi %s1301_s18, %s1525_s18   ;;  %s1213_s17 = sphi %s1299_s17, %s1524_s17  }
   0xd   : > { %1512 = sst [smem:[#allocation9_spill]] %s1233_s1  ;;  %p42_p0 = scmp.ge.s32.totalorder %s41_s22, 2 }
   0xe   : > { %s44_s23 = sadd.s32 1, %s1233_s1  ;;  %p90_p1 = scmp.ne.s32.totalorder %s1217_s18, %s1213_s17 }
   0xf   : > { %s1527_s23 = smov (!%p42_p0, %s44_s23), %s1233_s1  ;;  %p91_p2 = scmp.eq.s32.totalorder %s1237_s21, 0 }
  0x10   : > { %p46_p3 = scmp.ge.s32.totalorder %s1527_s23, 8  ;;  %s76_s24 = sld [smem:[#allocation4 + %s1233_s1]] }
  0x11   : > { %p92_p4 = por %p91_p2, %p90_p1  ;;  %s1531_s22 = smov (%p42_p0, %s41_s22), 0 }
  0x12   : > { %s1529_s23 = smov (%p46_p3, %s1527_s23), 0  ;;  %1514 = sst [smem:[#allocation11_spill]] %s1531_s22 }
  0x13   : > { %1513 = sst [smem:[#allocation10_spill]] %s1529_s23  ;;  %s79_s26 = ssub.s32 %s1229_s20, %s1531_s22 }
  0x14   : > { %s77_s25 = sld [smem:[#allocation4 + %s1529_s23]]  ;;  %s83_s29 = sadd.s32 1, %s1217_s18 }
  0x15   : > { %p990_p6 = scmp.ge.s32.totalorder %s1237_s21, 16 }
  0x1a   : > { %s78_s27 = ssub.s32 %s76_s24, %s77_s25 }
  0x1b   : > { %s80_s28 = sor.u32 %s79_s26, %s78_s27 }
  0x1c   : > { %p81_p5 = scmp.eq.s32.totalorder %s80_s28, 0  ;;  %286 = sbr.rel (%p990_p6) target bundleno = 60 (0x3c), region = 16 }
  0x1e   : > { %s1350_s30 = scalar_select %p81_p5, %s1217_s18, %s83_s29  }
  0x20   : > { %1515 = sst [smem:[#allocation12_spill]] %s1350_s30 }
  0x21   : > { %298 = sbr.rel (!%p92_p4) target bundleno = 60 (0x3c), region = 24  ;;  %s303_s10 = sld [smem:[#allocation4 + %s1233_s1]] (%p92_p4) }
  0x22   : > { %s300_s11 = sand.u32 (%p92_p4), 1, %s1217_s18   ;;  %s1516_s3 = sld [smem:[#allocation13_spill]] (%p92_p4) }
  0x23   : > { %s991_s12 = sshll.u32 (%p92_p4), %s300_s11, 6 }
  0x24   : > { %s302_s26 = scalar_lea.vmem (%p92_p4), [#allocation6], %s991_s12 }
  0x27   : > { %s992_s13 = sshll.u32 %s303_s10, 5 }
  0x28   : > { %s305_s14 = sadd.s32 %s1229_s20, %s992_s13 }
  0x29   : > { %s993_s15 = sshll.u32 %s305_s14, 2 }
  0x2a   : > { %s1359_s25 = scalar_lea.vmem %s1516_s3, %s993_s15 }
  0x2b   : > { %v324_v0 = vld [vmem:[%s1359_s25] sm:$0xf]  ;;  %v326_v1 = vld [vmem:[%s1359_s25 + $0x8] sm:$0xf]  ;;  %v328_v2 = vld [vmem:[%s1359_s25 + $0x10] sm:$0xf] }
  0x2c   : > { %325 = vst [vmem:[%s302_s26] sm:$0xf] %v324_v0  ;;  %v330_v3 = vld [vmem:[%s1359_s25 + $0x18] sm:$0xf]  ;;  %v332_v4 = vld [vmem:[%s1359_s25 + $0x20] sm:$0xf] }
  0x2d   : > { %327 = vst [vmem:[%s302_s26 + $0x4] sm:$0xf] %v326_v1  ;;  %v334_v5 = vld [vmem:[%s1359_s25 + $0x28] sm:$0xf]  ;;  %v336_v6 = vld [vmem:[%s1359_s25 + $0x30] sm:$0xf] }
  0x2e   : > { %329 = vst [vmem:[%s302_s26 + $0x8] sm:$0xf] %v328_v2  ;;  %v338_v7 = vld [vmem:[%s1359_s25 + $0x38] sm:$0xf]  ;;  %v340_v8 = vld [vmem:[%s1359_s25 + $0x40] sm:$0xf] }
  0x2f   : > { %331 = vst [vmem:[%s302_s26 + $0xc] sm:$0xf] %v330_v3  ;;  %v342_v9 = vld [vmem:[%s1359_s25 + $0x48] sm:$0xf]  ;;  %v344_v10 = vld [vmem:[%s1359_s25 + $0x50] sm:$0xf] }
  0x30   : > { %333 = vst [vmem:[%s302_s26 + $0x10] sm:$0xf] %v332_v4  ;;  %v346_v11 = vld [vmem:[%s1359_s25 + $0x58] sm:$0xf]  ;;  %v348_v12 = vld [vmem:[%s1359_s25 + $0x60] sm:$0xf] }
  0x31   : > { %335 = vst [vmem:[%s302_s26 + $0x14] sm:$0xf] %v334_v5  ;;  %v350_v13 = vld [vmem:[%s1359_s25 + $0x68] sm:$0xf]  ;;  %v352_v14 = vld [vmem:[%s1359_s25 + $0x70] sm:$0xf] }
  0x32   : > { %337 = vst [vmem:[%s302_s26 + $0x18] sm:$0xf] %v336_v6  ;;  %v354_v15 = vld [vmem:[%s1359_s25 + $0x78] sm:$0xf] }
  0x33   : > { %339 = vst [vmem:[%s302_s26 + $0x1c] sm:$0xf] %v338_v7 }
  0x34   : > { %341 = vst [vmem:[%s302_s26 + $0x20] sm:$0xf] %v340_v8 }
  0x35   : > { %343 = vst [vmem:[%s302_s26 + $0x24] sm:$0xf] %v342_v9 }
  0x36   : > { %345 = vst [vmem:[%s302_s26 + $0x28] sm:$0xf] %v344_v10 }
  0x37   : > { %347 = vst [vmem:[%s302_s26 + $0x2c] sm:$0xf] %v346_v11 }
  0x38   : > { %349 = vst [vmem:[%s302_s26 + $0x30] sm:$0xf] %v348_v12 }
  0x39   : > { %351 = vst [vmem:[%s302_s26 + $0x34] sm:$0xf] %v350_v13 }
  0x3a   : > { %353 = vst [vmem:[%s302_s26 + $0x38] sm:$0xf] %v352_v14 }
  0x3b   : > { %355 = vst [vmem:[%s302_s26 + $0x3c] sm:$0xf] %v354_v15 }
  0x3c PF: > { %p994_p7 = scmp.ge.s32.totalorder %s1237_s21, 1  ;;  %p461_p8 = scmp.lt.s32.totalorder %s1237_s21, 17 }
  0x3e   : > { %p462_p9 = pnand %p994_p7, %p461_p8 }
  0x3f   : > { %s468_s27 = sand.u32 (!%p462_p9), 1, %s1213_s17   ;;  %s533_s28 = sld [smem:[#allocation5 + %s1225_s0]] (!%p462_p9) }
  0x40   : > { %465 = sbr.rel (%p462_p9) target bundleno = 715 (0x2cb), region = 85  ;;  %s1381_s29 = sshll.u32 (!%p462_p9), %s468_s27, 6 }
  0x41   : > { %s540_s10 = sld [smem:[#allocation4 + %s1225_s0]] (!%p462_p9)  ;;  %p543_p10 = scmp.lt.s32.totalorder (!%p462_p9), %s1221_s19, 1 }
  0x42   : > { %s549_s11 = sld [smem:[#allocation4 + %s1225_s0]] (!%p462_p9)  ;;  %s998_s12 = sshll.u32 (!%p462_p9), %s1221_s19, 4 }
  0x43   : > { %p1388_p11 = scmp.lt.s32.totalorder (!%p462_p9), %s998_s12, 31  ;;  %s561_s15 = sld [smem:[#allocation4 + %s1225_s0]] (!%p462_p9) }
  0x44   : > { %s566_s16 = sld [smem:[#allocation4 + %s1225_s0]] (!%p462_p9)  ;;  %p576_p4 = scmp.lt.s32.totalorder (!%p462_p9), %s1225_s0, 7 }
  0x45   : > { %s544_s13 = scalar_select %p543_p10, %s1221_s19, 1 }
  0x46   : > { %p534_p12 = scmp.lt.s32.totalorder %s533_s28, 11  ;;  %s571_s24 = sld [smem:[#allocation4 + %s1225_s0]] }
  0x47   : > { %p541_p13 = scmp.lt.s32.totalorder %s540_s10, 3  ;;  %s1539_s12 = smov (!%p1388_p11, %s998_s12), 31 }
  0x48   : > { %s1533_s28 = smov (!%p534_p12, %s533_s28), 11  ;;  %p551_p0 = scmp.lt.s32.totalorder %s549_s11, 3 }
  0x49   : > { %s1535_s10 = smov (!%p541_p13, %s540_s10), 3  ;;  %s996_s17 = sshll.u32 %s1533_s28, 2 }
  0x4a   : > { %s1398_s27 = scalar_lea.vmem %s1497_s2, %s996_s17  ;;  %s997_s3 = sshll.u32 %s1535_s10, 1 }
  0x4b   : > { %s1400_s23 = sadd.s32 %s997_s3, %s544_s13  ;;  %s1537_s11 = smov (!%p551_p0, %s549_s11), 3 }
  0x4c   : > { %s999_s30 = sshll.u32 %s1537_s11, 5  ;;  %p562_p1 = scmp.lt.s32.totalorder %s561_s15, 3 }
  0x4d   : > { %s556_s28 = sadd.s32 %s999_s30, %s1539_s12  ;;  %p567_p2 = scmp.lt.s32.totalorder %s566_s16, 3 }
  0x4e   : > { %s1000_s25 = sshll.u32 %s556_s28, 2  ;;  %p572_p3 = scmp.lt.s32.totalorder %s571_s24, 3 }
  0x4f   : > { %s1411_s3 = scalar_lea.vmem %s1500_s5, %s1000_s25  ;;  %s1541_s15 = smov (!%p562_p1, %s561_s15), 3 }
  0x50   : > { %s1543_s16 = smov (!%p567_p2, %s566_s16), 3  ;;  %s564_s11 = scalar_lea.vmem %s1501_s6, %s1541_s15 }
  0x51   : > { %s569_s13 = scalar_lea.vmem %s1502_s7, %s1543_s16  ;;  %s1545_s24 = smov (!%p572_p3, %s571_s24), 3 }
  0x52   : > { %s1547_s0 = smov (!%p576_p4, %s1225_s0), 7  ;;  %s574_s28 = scalar_lea.vmem %s1503_s8, %s1545_s24 }
  0x53   : > { %s1001_s25 = sshll.u32 %s1547_s0, 2  ;;  %s470_s1 = scalar_lea.vmem [#allocation6], %s1381_s29 }
  0x54   : > { %s1436_s20 = scalar_lea.vmem %s1504_s9, %s1001_s25  ;;  %p1002_p5 = scmp.ne.s32.totalorder %s1221_s19, 0 }
  0x56   : > { %583 = sbr.rel (%p1002_p5) target bundleno = 93 (0x5d), region = 93 }
  0x5b   : > { %v1241_v16 = vmov 0.0  }
  0x5c   : > { %584 = vst [vmem:[#allocation2] sm:$0xff] %v1241_v16 }
  0x5d PF: > { %v1078_v17 = vld [vmem:[%s470_s1 + $0x38] sm:$0xff]  ;;  %v1077_v18 = vld [vmem:[%s470_s1 + $0x30] sm:$0xff]  ;;  %v1076_v19 = vld [vmem:[%s470_s1 + $0x28] sm:$0xff]  ;;  %s1518_s22 = scalar_lea.vmem %s1499_s4, %s1400_s23  ;;  %p1068_p6 = scmp.ne.s32.totalorder %s1221_s19, 1 }
  0x5e   : > { %654 = vmatpush.bf16.msra.mxu0 %v1078_v17  ;;  %v1075_v20 = vld [vmem:[%s470_s1 + $0x20] sm:$0xff]  ;;  %v1074_v21 = vld [vmem:[%s470_s1 + $0x18] sm:$0xff]  ;;  %v1073_v22 = vld [vmem:[%s470_s1 + $0x10] sm:$0xff] }
  0x5f   : > { %v1072_v23 = vld [vmem:[%s470_s1 + $0x8] sm:$0xff]  ;;  %v1071_v24 = vld [vmem:[%s470_s1] sm:$0xff]  ;;  %v1441_v25 = vld [vmem:[%s1398_s27] sm:$0xf] }
  0x60   : > { %v1086_v26 = vld [vmem:[%s1411_s3 + $0x38] sm:$0xff]  ;;  %v1085_v27 = vld [vmem:[%s1411_s3 + $0x30] sm:$0xff]  ;;  %v1147_v28 = vld [vmem:[%s1518_s22] ss:$0 sm:$0xff] }
  0x61   : > { %777 = vmatpush.bf16.msra.mxu1 %v1086_v26  ;;  %v1084_v29 = vld [vmem:[%s1411_s3 + $0x28] sm:$0xff]  ;;  %v1083_v32 = vld [vmem:[%s1411_s3 + $0x20] sm:$0xff]  ;;  %v1082_v35 = vld [vmem:[%s1411_s3 + $0x18] sm:$0xff] }
  0x62   : > { %655 = vmatpush.bf16.msra.mxu0 %v1077_v18  ;;  %v1081_v39 = vld [vmem:[%s1411_s3 + $0x10] sm:$0xff]  ;;  %v1080_v44 = vld [vmem:[%s1411_s3 + $0x8] sm:$0xff]  ;;  %v1079_v48 = vld [vmem:[%s1411_s3] sm:$0xff] }
  0x63   : > { %v711_v14 = vld [vmem:[#allocation2] sm:$0xff] }
  0x65   : > { %778 = vmatpush.bf16.msra.mxu1 %v1085_v27 }
  0x66   : > { %656 = vmatpush.bf16.msra.mxu0 %v1076_v19 }
  0x69   : > { %779 = vmatpush.bf16.msra.mxu1 %v1084_v29 }
  0x6a   : > { %657 = vmatpush.bf16.msra.mxu0 %v1075_v20 }
  0x6d   : > { %780 = vmatpush.bf16.msra.mxu1 %v1083_v32 }
  0x6e   : > { %658 = vmatpush.bf16.msra.mxu0 %v1074_v21 }
  0x71   : > { %781 = vmatpush.bf16.msra.mxu1 %v1082_v35 }
  0x72   : > { %659 = vmatpush.bf16.msra.mxu0 %v1073_v22 }
  0x75   : > { %782 = vmatpush.bf16.msra.mxu1 %v1081_v39 }
  0x76   : > { %660 = vmatpush.bf16.msra.mxu0 %v1072_v23 }
  0x79   : > { %783 = vmatpush.bf16.msra.mxu1 %v1080_v44 }
  0x7a   : > { %661 = vmatpush.bf16.msra.mxu0 %v1071_v24 }
  0x7d   : > { %662 = vmatmul.bf16.vlgmr.msra.gmra.mxu0 %v1441_v25  ;;  %784 = vmatpush.bf16.msra.mxu1 %v1079_v48 }
  0xfa   : > { %v663_v30 = vpop.f32.mrf.mxu0 }
  0xfb   : > { %v664_v31 = vadd.f32 %v1147_v28, %v663_v30 }
  0xfd   : > { %v668_v33 = vmul.f32 0.70710677, %v664_v31  ;;  %v667_v10 = vmul.f32 0.5, %v664_v31 }
  0xff   : > { %v669_v34 = vmul.f32 %v668_v33, %v668_v33 }
 0x101   : > { %v670_v36 = vmin.f32 %v669_v34, 16.0 }
 0x102   : > { %v665_v37 = vpop.f32.mrf.mxu0 }
 0x103   : > { %v671_v38 = vmul.f32 2.1237322e-06, %v670_v36  ;;  %v682_v40 = vmul.f32 3.8918573e-05, %v670_v36 }
 0x105   : > { %v672_v41 = vadd.f32 0.00028619796, %v671_v38  ;;  %v683_v42 = vadd.f32 0.001143296, %v682_v40 }
 0x107   : > { %v673_v43 = vmul.f32 %v672_v41, %v670_v36  ;;  %v684_v45 = vmul.f32 %v683_v42, %v670_v36 }
 0x109   : > { %v685_v46 = vadd.f32 0.014752088, %v684_v45  ;;  %v674_v47 = vadd.f32 0.0036580483, %v673_v43 }
 0x10b   : > { %v686_v49 = vmul.f32 %v685_v46, %v670_v36  ;;  %v675_v51 = vmul.f32 %v674_v47, %v670_v36 }
 0x10d   : > { %v687_v50 = vadd.f32 0.112945676, %v686_v49  ;;  %v676_v54 = vadd.f32 0.05243302, %v675_v51 }
 0x10f   : > { %v688_v52 = vmul.f32 %v687_v50, %v670_v36  ;;  %v677_v57 = vmul.f32 %v676_v54, %v670_v36 }
 0x111   : > { %v689_v53 = vadd.f32 0.4994258, %v688_v52  ;;  %v678_v58 = vadd.f32 0.18741608, %v677_v57 }
 0x113   : > { %v690_v55 = vmul.f32 %v689_v53, %v670_v36  ;;  %v679_v60 = vmul.f32 %v678_v58, %v670_v36 }
 0x115   : > { %v691_v56 = vadd.f32 1.0, %v690_v55  ;;  %v680_v0 = vadd.f32 1.1283791, %v679_v60 }
 0x117   : > { %1148 = vrcp.f32 %v691_v56  ;;  %v703_v63 = vand.u32 2147483648, %v691_v56  ;;  %v701_v2 = vand.u32 2147483647, %v691_v56  ;;  %vm697_vm1 = vweird.f32 %v691_v56 }
 0x118   : > { %v681_v5 = vmul.f32 %v680_v0, %v668_v33 }
 0x119   : > { %v704_v4 = vor.u32 1.1754944e-38, %v703_v63  ;;  %vm702_vm3 = vcmp.eq.f32.partialorder %v701_v2, 8.507059e+37 }
 0x11d   : > { %v1149_v59 = vpop.eup %1148 }
 0x11e   : > { %v693_v61 = vmul.f32 %v1149_v59, %v691_v56  ;;  %vm698_vm0 = vweird.f32 %v1149_v59 }
 0x11f   : > { %vm699_vm2 = vmor %vm697_vm1, %vm698_vm0 }
 0x120   : > { %v694_v62 = vsub.f32 1.0, %v693_v61 }
 0x122   : > { %v695_v1 = vmul.f32 %v1149_v59, %v694_v62 }
 0x124   : > { %v696_v3 = vadd.f32 %v1149_v59, %v695_v1 }
 0x126   : > { %v700_v6 = vsel %vm699_vm2, %v1149_v59, %v696_v3 }
 0x127   : > { %v705_v7 = vsel %vm702_vm3, %v704_v4, %v700_v6 }
 0x128   : > { %v706_v8 = vmul.f32 %v705_v7, %v681_v5 }
 0x12a   : > { %v1035_v9 = vclamps-f32 %v706_v8, 1.0 }
 0x12c   : > { %v709_v11 = vadd.f32 1.0, %v1035_v9 }
 0x12e   : > { %v710_v12 = vmul.f32 %v709_v11, %v667_v10 }
 0x130   : > { %v712_v13 = vpack.c.bf16 %v710_v12, %v710_v12 }
 0x132   : > { %785 = vmatmul.bf16.vlgmr.msra.gmra.mxu1 %v712_v13 }
 0x1af   : > { %v786_v15 = vpop.f32.mrf.mxu1 }
 0x1b0   : > { %v790_v16 = vadd.f32 %v786_v15, %v711_v14 }
 0x1b2   : > { %791 = vst [vmem:[#allocation2] sm:$0xff] %v790_v16 }
 0x1b3   : > { %795 = sbr.rel (%p1068_p6) target bundleno = 715 (0x2cb), region = 97 }
 0x1b7   : > { %v788_v17 = vpop.f32.mrf.mxu1 }
 0x1b8   : > { %v1150_v19 = vld [vmem:[%s564_s11] ss:$0 sm:$0xff]  ;;  %v802_v20 = vunpack.c.l.bf16 %v1441_v25  ;;  %v1242_v23 = vmov 128.0  }
 0x1b9   : > { %v796_v18 = vld [vmem:[#allocation2] sm:$0xff]  ;;  %1153 = vrcp.f32 %v1242_v23 }
 0x1ba   : > { %v801_v21 = vadd.f32 %v1150_v19, %v796_v18  ;;  %v1151_v43 = vld [vmem:[%s569_s13] ss:$0 sm:$0xff] }
 0x1bb   : > { %v1152_v45 = vld [vmem:[%s574_s28] ss:$0 sm:$0xff] }
 0x1bc   : > { %v803_v22 = vadd.f32 %v802_v20, %v801_v21 }
 0x1be   : > { %804 = vadd.xlane.f32.xlu0 %v803_v22 }
 0x1bf   : > { %v1154_v24 = vpop.eup %1153 }
 0x1c0   : > { %v807_v26 = vmul.f32 128.0, %v1154_v24  ;;  %vm811_vm4 = vweird.f32 %v1154_v24 }
 0x1c2   : > { %v808_v27 = vsub.f32 1.0, %v807_v26 }
 0x1c4   : > { %v809_v28 = vmul.f32 %v1154_v24, %v808_v27 }
 0x1c6   : > { %v810_v29 = vadd.f32 %v1154_v24, %v809_v28 }
 0x1c8   : > { %v812_v30 = vsel %vm811_vm4, %v1154_v24, %v810_v29 }
 0x231   : > { %v805_v31 = vpop.xlane.xlu0 %804 }
 0x232   : > { %v813_v32 = vmul.f32 %v812_v30, %v805_v31 }
 0x234   : > { %v814_v33 = vsub.f32 %v803_v22, %v813_v32 }
 0x236   : > { %v815_v34 = vmul.f32 %v814_v33, %v814_v33 }
 0x238   : > { %816 = vadd.xlane.f32.xlu0 %v815_v34 }
 0x2ab   : > { %v817_v25 = vpop.xlane.xlu0 %816 }
 0x2ac   : > { %v818_v35 = vmul.f32 %v817_v25, %v812_v30 }
 0x2ae   : > { %v819_v36 = vadd.f32 1e-12, %v818_v35 }
 0x2b0   : > { %1155 = vrsqrt.f32 %v819_v36  ;;  %vm826_vm6 = vweird.f32 %v819_v36 }
 0x2b6   : > { %v1156_v37 = vpop.eup %1155 }
 0x2b7   : > { %v821_v38 = vmul.f32 %v1156_v37, %v819_v36  ;;  %vm827_vm5 = vweird.f32 %v1156_v37 }
 0x2b8   : > { %vm828_vm7 = vmor %vm826_vm6, %vm827_vm5 }
 0x2b9   : > { %v822_v39 = vmul.f32 %v1156_v37, %v821_v38 }
 0x2bb   : > { %v823_v40 = vmul.f32 0.5, %v822_v39 }
 0x2bd   : > { %v824_v41 = vsub.f32 1.5, %v823_v40 }
 0x2bf   : > { %v825_v42 = vmul.f32 %v1156_v37, %v824_v41 }
 0x2c1   : > { %v829_v44 = vsel %vm828_vm7, %v1156_v37, %v825_v42 }
 0x2c2   : > { %v830_v46 = vmul.f32 %v829_v44, %v814_v33 }
 0x2c4   : > { %v835_v47 = vmul.f32 %v1151_v43, %v830_v46 }
 0x2c6   : > { %v840_v48 = vadd.f32 %v1152_v45, %v835_v47 }
 0x2c8   : > { %v841_v49 = vpack.c.bf16 %v840_v48, %v840_v48 }
 0x2ca   : > { %842 = vst [vmem:[%s1436_s20] sm:$0xf] %v841_v49 }
 0x2cb PF: > { %s32_s21 = sadd.s32 1, %s1237_s21   ;;  %s1519_s16 = sld [smem:[#allocation12_spill]] }
 0x2cc   : > { %p29_p7 = scmp.ge.s32.totalorder %s32_s21, 18   ;;  %s1520_s19 = sld [smem:[#allocation8_spill]] }
 0x2cd   : > { %s1521_s0 = sld [smem:[#allocation9_spill]]  ;;  %s1524_s17 = smov %s1217_s18 }
 0x2ce   : > { %s1522_s20 = sld [smem:[#allocation11_spill]]  ;;  %31 = sbr.rel (!%p29_p7) target bundleno = 12 (0xc), region = 150 }
 0x2cf   : > { %s1523_s1 = sld [smem:[#allocation10_spill]] }
 0x2d1   : > { %s1525_s18 = smov %s1519_s16 }

</bundles_post_ra>
